<compile_context>
chip_gen: v7x
topology: tpu7x:2x2x1
jax: 0.10.0
libtpu: 0.0.40
codegen_flags: <defaults>
</compile_context>

<pallas_src>
import numpy as np
import jax
import jax.numpy as jnp
from jax.experimental import pallas as pl
from jax.experimental.pallas import tpu as pltpu

# ---------------- hyperparameters (from the module defaults) ----------------
SAMPLE_RATE = 16000
N_FFT = 512
WIN_LENGTH = 25 * 16     # 400
HOP_LENGTH = 10 * 16     # 160
N_MELS = 80              # feat_dim
N_MELS_PAD = 128         # lane-aligned mel dim (extra bins are exactly zero-weighted)
N_FREQS = N_FFT // 2     # 256 (Nyquist bin dropped: its mel weight is identically 0)
D_MODEL = 512
EPS = 1e-6
TM_MAX = 512             # row tile (safe for 16 MiB v5e scoped VMEM and 64 MiB v7x)


# ---------------- torchaudio-equivalent constant matrices (host/numpy) ------
def _hann_window_periodic(win_length, n_fft):
    n = np.arange(win_length, dtype=np.float64)
    w = 0.5 - 0.5 * np.cos(2.0 * np.pi * n / win_length)   # torch.hann_window (periodic)
    pad_left = (n_fft - win_length) // 2
    pad_right = n_fft - win_length - pad_left
    return np.pad(w, (pad_left, pad_right))                 # (n_fft,) float64


def _fused_dft_basis(n_fft):
    """Window-folded [cos | -sin] DFT basis, Nyquist column dropped: (n_fft, 2*(n_fft//2))."""
    n_freqs = n_fft // 2
    n = np.arange(n_fft, dtype=np.float64)[:, None]
    k = np.arange(n_freqs, dtype=np.float64)[None, :]
    ang = 2.0 * np.pi * n * k / n_fft
    win = _hann_window_periodic(WIN_LENGTH, n_fft)[:, None]
    cos_b = np.cos(ang) * win
    sin_b = -np.sin(ang) * win
    return np.concatenate([cos_b, sin_b], axis=1).astype(np.float32)   # (512, 512)


def _melscale_fbanks(n_freqs_full, f_min, f_max, n_mels, sample_rate):
    # torchaudio.functional.melscale_fbanks, norm=None, mel_scale="htk"
    def hz_to_mel(f):
        return 2595.0 * np.log10(1.0 + f / 700.0)

    def mel_to_hz(m):
        return 700.0 * (10.0 ** (m / 2595.0) - 1.0)

    all_freqs = np.linspace(0.0, sample_rate // 2, n_freqs_full)
    m_pts = np.linspace(hz_to_mel(f_min), hz_to_mel(f_max), n_mels + 2)
    f_pts = mel_to_hz(m_pts)
    f_diff = f_pts[1:] - f_pts[:-1]
    slopes = f_pts[None, :] - all_freqs[:, None]
    down = -slopes[:, :-2] / f_diff[:-1]
    up = slopes[:, 2:] / f_diff[1:]
    fb = np.maximum(0.0, np.minimum(down, up))
    return fb.astype(np.float32)                 # (n_freqs_full, n_mels)


def _stacked_mel_fb():
    """Double-stacked, lane-padded mel filterbank: (2*N_FREQS, N_MELS_PAD) = (512, 128)."""
    fb = _melscale_fbanks(N_FFT // 2 + 1, 0.0, SAMPLE_RATE / 2, N_MELS, SAMPLE_RATE)
    fb = fb[:N_FREQS, :]                                        # drop Nyquist row (all zeros)
    fb = np.pad(fb, ((0, 0), (0, N_MELS_PAD - N_MELS)))         # (256, 128)
    return np.concatenate([fb, fb], axis=0)                     # (512, 128): re^2 + im^2


# ---------------- Pallas kernel ---------------------------------------------
def audio_features_kernel(frames_ref, basis_ref, mel_ref, w_ref, b_ref, out_ref):
    # frames_ref: (TM, 512) bf16 raw frames; basis_ref: (512, 512) bf16 windowed DFT
    y = jnp.dot(frames_ref[...], basis_ref[...],
                preferred_element_type=jnp.float32)              # (TM, 512) = [re | im]
    power = y * y                                                # squared components
    mel = jnp.dot(power, mel_ref[...],
                  preferred_element_type=jnp.float32)            # (TM, 128) = re^2@fb + im^2@fb
    logmel = jnp.log(mel + EPS)
    out_ref[...] = (jnp.dot(logmel, w_ref[...],
                            preferred_element_type=jnp.float32) + b_ref[...])


def audio_features_pallas(frames, basis, mel_fb2, w_pad, bias, tm):
    """frames: (M_pad, 512) bf16. Returns (M_pad, D_MODEL) f32."""
    M = frames.shape[0]
    grid = (M // tm,)

    def const(shape):
        return pl.BlockSpec(shape, lambda i: (0, 0))

    flops = 2 * M * (N_FFT * 2 * N_FREQS            # DFT matmul
                     + 2 * N_FREQS * N_MELS_PAD     # mel matmul
                     + N_MELS_PAD * D_MODEL)        # linear matmul
    bytes_accessed = (frames.size * frames.dtype.itemsize
                      + M * D_MODEL * 4
                      + basis.size * basis.dtype.itemsize
                      + (mel_fb2.size + w_pad.size + bias.size) * 4)

    return pl.pallas_call(
        audio_features_kernel,
        out_shape=jax.ShapeDtypeStruct((M, D_MODEL), jnp.float32),
        grid_spec=pltpu.PrefetchScalarGridSpec(
            num_scalar_prefetch=0,
            grid=grid,
            in_specs=[
                pl.BlockSpec((tm, N_FFT), lambda i: (i, 0)),     # frames: tiled over M
                const(basis.shape),                              # constants stay resident
                const(mel_fb2.shape),
                const(w_pad.shape),
                const(bias.shape),
            ],
            out_specs=pl.BlockSpec((tm, D_MODEL), lambda i: (i, 0)),
        ),
        compiler_params=pltpu.CompilerParams(
            dimension_semantics=("parallel",)),
        cost_estimate=pl.CostEstimate(
            flops=int(flops),
            transcendentals=int(M * N_MELS_PAD),
            bytes_accessed=int(bytes_accessed)),
    )(frames, basis, mel_fb2, w_pad, bias)


# ---------------- end-to-end forward (glue + kernel) -------------------------
def audio_features_forward(wav, w_lin, b_lin):
    """wav: (B, N) float32 waveform -> (B, T, d_model). w_lin: (80, 512) (= W.T), b_lin: (1, 512)."""
    B, N = wav.shape
    # center=True, pad_mode="reflect" (torch.stft inside torchaudio.Spectrogram)
    pad = N_FFT // 2
    padded = jnp.pad(wav, ((0, 0), (pad, pad)), mode="reflect")
    T = 1 + N // HOP_LENGTH
    idx = np.arange(T)[:, None] * HOP_LENGTH + np.arange(N_FFT)[None, :]  # (T, n_fft)
    frames = padded[:, idx].reshape(B * T, N_FFT)

    # pick a row tile and pad M to a multiple of it (multiple of 16 for bf16 packing)
    M = B * T
    tm = min(TM_MAX, ((M + 15) // 16) * 16)
    M_pad = ((M + tm - 1) // tm) * tm
    if M_pad != M:
        frames = jnp.pad(frames, ((0, M_pad - M), (0, 0)))
    frames = frames.astype(jnp.bfloat16)

    basis = jnp.asarray(_fused_dft_basis(N_FFT), dtype=jnp.bfloat16)      # (512, 512)
    mel_fb2 = jnp.asarray(_stacked_mel_fb(), dtype=jnp.float32)           # (512, 128)
    w_pad = jnp.pad(w_lin.astype(jnp.float32),
                    ((0, N_MELS_PAD - N_MELS), (0, 0)))                   # (128, 512)
    bias = b_lin.reshape(1, D_MODEL).astype(jnp.float32)

    out = audio_features_pallas(frames, basis, mel_fb2, w_pad, bias, tm)  # (M_pad, 512)
    return out[:M].reshape(B, T, D_MODEL)


if __name__ == "__main__":
    key = jax.random.PRNGKey(0)
    k_wav, k_w, k_b = jax.random.split(key, 3)

    # small but consistent: B=2, 1600 samples (0.1 s @ 16 kHz) -> T = 11 frames
    B, N = 2, 1600
    wav = jax.random.normal(k_wav, (B, N), dtype=jnp.float32)

    # deterministic Linear(feat_dim=80, d_model=512) init (PyTorch-style uniform)
    bound = 1.0 / np.sqrt(N_MELS)
    w_lin = jax.random.uniform(k_w, (N_MELS, D_MODEL), jnp.float32, -bound, bound)
    b_lin = jax.random.uniform(k_b, (1, D_MODEL), jnp.float32, -bound, bound)

    out = audio_features_forward(wav, w_lin, b_lin)
    jax.block_until_ready(out)
    assert out.shape == (B, 1 + N // HOP_LENGTH, D_MODEL)
    assert bool(jnp.all(jnp.isfinite(out)))
    print("KERNEL_OK")
</pallas_src>

<mosaic_0001>
module attributes {stable_mosaic.version = 11 : i64} {
  func.func @audio_features_kernel(%arg0: i32, %arg1: memref<32x512xbf16, #tpu.memory_space<vmem>>, %arg2: memref<512x512xbf16, #tpu.memory_space<vmem>>, %arg3: memref<512x128xf32, #tpu.memory_space<vmem>>, %arg4: memref<128x512xf32, #tpu.memory_space<vmem>>, %arg5: memref<1x512xf32, #tpu.memory_space<vmem>>, %arg6: memref<32x512xf32, #tpu.memory_space<vmem>>) attributes {dimension_semantics = [#tpu.dimension_semantics<parallel>], iteration_bounds = array<i64: 1>, scalar_prefetch = 0 : i64, scratch_operands = 0 : i64, tpu.core_type = #tpu.core_type<tc>, window_params = [{transform_indices = @transform_0, window_bounds = array<i64: 32, 512>}, {pipeline_mode = #tpu.pipeline_mode<synchronous>, transform_indices = @transform_1, window_bounds = array<i64: 512, 512>}, {pipeline_mode = #tpu.pipeline_mode<synchronous>, transform_indices = @transform_2, window_bounds = array<i64: 512, 128>}, {pipeline_mode = #tpu.pipeline_mode<synchronous>, transform_indices = @transform_3, window_bounds = array<i64: 128, 512>}, {pipeline_mode = #tpu.pipeline_mode<synchronous>, transform_indices = @transform_4, window_bounds = array<i64: 1, 512>}, {transform_indices = @transform_5, window_bounds = array<i64: 32, 512>}]} {
    %c0 = arith.constant 0 : index
    %c0_0 = arith.constant 0 : index
    %0 = vector.load %arg1[%c0, %c0_0] : memref<32x512xbf16, #tpu.memory_space<vmem>>, vector<32x512xbf16>
    %c0_1 = arith.constant 0 : index
    %c0_2 = arith.constant 0 : index
    %1 = vector.load %arg2[%c0_1, %c0_2] : memref<512x512xbf16, #tpu.memory_space<vmem>>, vector<512x512xbf16>
    %cst = arith.constant dense<0.000000e+00> : vector<32x512xf32>
    %2 = tpu.matmul %0, %1, %cst {dimension_numbers = #tpu.dot_dimension_numbers<[1], [0], [0], [1], [0, 0, 1, 1], [], []>} : vector<32x512xbf16>, vector<512x512xbf16>, vector<32x512xf32> -> vector<32x512xf32>
    %3 = arith.mulf %2, %2 : vector<32x512xf32>
    %c0_3 = arith.constant 0 : index
    %c0_4 = arith.constant 0 : index
    %4 = vector.load %arg3[%c0_3, %c0_4] : memref<512x128xf32, #tpu.memory_space<vmem>>, vector<512x128xf32>
    %cst_5 = arith.constant dense<0.000000e+00> : vector<32x128xf32>
    %5 = tpu.matmul %3, %4, %cst_5 {dimension_numbers = #tpu.dot_dimension_numbers<[1], [0], [0], [1], [0, 0, 1, 1], [], []>} : vector<32x512xf32>, vector<512x128xf32>, vector<32x128xf32> -> vector<32x128xf32>
    %cst_6 = arith.constant 9.99999997E-7 : f32
    %6 = vector.broadcast %cst_6 : f32 to vector<32x128xf32>
    %7 = arith.addf %5, %6 : vector<32x128xf32>
    %8 = math.log %7 : vector<32x128xf32>
    %c0_7 = arith.constant 0 : index
    %c0_8 = arith.constant 0 : index
    %9 = vector.load %arg4[%c0_7, %c0_8] : memref<128x512xf32, #tpu.memory_space<vmem>>, vector<128x512xf32>
    %cst_9 = arith.constant dense<0.000000e+00> : vector<32x512xf32>
    %10 = tpu.matmul %8, %9, %cst_9 {dimension_numbers = #tpu.dot_dimension_numbers<[1], [0], [0], [1], [0, 0, 1, 1], [], []>} : vector<32x128xf32>, vector<128x512xf32>, vector<32x512xf32> -> vector<32x512xf32>
    %c0_10 = arith.constant 0 : index
    %c0_11 = arith.constant 0 : index
    %11 = vector.load %arg5[%c0_10, %c0_11] : memref<1x512xf32, #tpu.memory_space<vmem>>, vector<1x512xf32>
    %12 = vector.broadcast %11 : vector<1x512xf32> to vector<32x512xf32>
    %13 = arith.addf %10, %12 : vector<32x512xf32>
    %c0_12 = arith.constant 0 : index
    %c0_13 = arith.constant 0 : index
    %14 = vector.load %arg6[%c0_12, %c0_13] : memref<32x512xf32, #tpu.memory_space<vmem>>, vector<32x512xf32>
    tpu.vector_store %arg6[%c0_12, %c0_13], %13 {strides = array<i32>} : memref<32x512xf32, #tpu.memory_space<vmem>>, vector<32x512xf32>,
    return
  }
  func.func @transform_0(%arg0: i32) -> (i32, i32) {
    %c0_i32 = arith.constant 0 : i32
    %c0_i32_0 = arith.constant 0 : i32
    return %arg0, %c0_i32 : i32, i32
  }
  func.func @transform_1(%arg0: i32) -> (i32, i32) {
    %c0_i32 = arith.constant 0 : i32
    %c0_i32_0 = arith.constant 0 : i32
    %c0_i32_1 = arith.constant 0 : i32
    return %c0_i32, %c0_i32_0 : i32, i32
  }
  func.func @transform_2(%arg0: i32) -> (i32, i32) {
    %c0_i32 = arith.constant 0 : i32
    %c0_i32_0 = arith.constant 0 : i32
    %c0_i32_1 = arith.constant 0 : i32
    return %c0_i32, %c0_i32_0 : i32, i32
  }
  func.func @transform_3(%arg0: i32) -> (i32, i32) {
    %c0_i32 = arith.constant 0 : i32
    %c0_i32_0 = arith.constant 0 : i32
    %c0_i32_1 = arith.constant 0 : i32
    return %c0_i32, %c0_i32_0 : i32, i32
  }
  func.func @transform_4(%arg0: i32) -> (i32, i32) {
    %c0_i32 = arith.constant 0 : i32
    %c0_i32_0 = arith.constant 0 : i32
    %c0_i32_1 = arith.constant 0 : i32
    return %c0_i32, %c0_i32_0 : i32, i32
  }
  func.func @transform_5(%arg0: i32) -> (i32, i32) {
    %c0_i32 = arith.constant 0 : i32
    %c0_i32_0 = arith.constant 0 : i32
    return %arg0, %c0_i32 : i32, i32
  }
}

</mosaic_0001>

<bundles_post_ra>
// kernel: tpu_custom_call.1
= control target key start
LH: loop header
LB: loop body
LE: loop exit
PB: predicated region body
PF: predicated region fallthrough
CT: control target
= control target key end

     0   :  { %10 = vsyncpa [#allocation3], 0  ;;  %s2489_s0 = inlined_call_operand.hbm [shape: bf16[32,512], index: 0, kind: input, shape index: {}]   ;;  %s2490_s1 = inlined_call_operand.hbm [shape: bf16[512,512], index: 1, kind: input, shape index: {}]   ;;  %s2491_s2 = inlined_call_operand.hbm [shape: f32[512,128], index: 2, kind: input, shape index: {}]   ;;  %s2492_s3 = inlined_call_operand.hbm [shape: f32[128,512], index: 3, kind: input, shape index: {}]   ;;  %s2493_s4 = inlined_call_operand.vmem [shape: f32[1,512], index: 4, kind: input, shape index: {}]   ;;  %s2494_s5 = inlined_call_operand.hbm [shape: f32[32,512], index: 5, kind: output, shape index: {}]  }
   0x1   :  { %11 = vsyncpa [#allocation6], 0 }
   0x2   :  { %12 = vsyncpa [#allocation9], 0 }
   0x3   :  { %13 = vsyncpa [#allocation4], 0  ;;  %s2371_s18 = smov [#allocation5]   ;;  %s2372_s20 = smov [#allocation2]  }
   0x4   :  { %s31_s19 = sshll.u32 %s2371_s18, 4  ;;  %s19_s21 = sshll.u32 %s2372_s20, 4  ;;  %s32_s19 = int_to_ptr.vmem [resolvable:$true] %s31_s19  ;;  %s2413_s21 = int_to_ptr.vmem [resolvable:$true] %s19_s21 }
   0x5   :  { %s2253_s24 = scalar_lea.hbm %s2490_s1, 16384 }
   0x6   :  { %p2254_p0 = scmp.ne.s32.totalorder %s2490_s1, %s2253_s24  ;;  %p2257_p1 = scmp.lt.u32.totalorder %s2253_s24, %s2490_s1 }
   0x8   :  { %p2259_p2 = pnand %p2257_p1, %p2254_p0 }
   0xa   :  { %2262 = shalt.err (!%p2259_p2)
}
   0xb   :  { %s2263_s29 = scalar_lea.vmem %s32_s19, 16384  ;;  %p2268_p4 = scmp.lt.s32.totalorder %s32_s19, %s32_s19 }
   0xc   :  { %p2264_p3 = scmp.ne.s32.totalorder %s32_s19, %s2263_s29  ;;  %p2269_p5 = scmp.lt.s32.totalorder %s2263_s29, %s2263_s29 }
   0xe   :  { %p2270_p6 = por %p2269_p5, %p2268_p4 }
  0x10   :  { %p2271_p7 = pnand %p2270_p6, %p2264_p3 }
  0x12   :  { %2274 = shalt.err (!%p2271_p7)
}
  0x13   :  { %s2373_s30 = smov 256   ;;  %s2374_s6 = smov 16  }
  0x14   :  { %37 = dma.hbm_to_vmem [thread:$0]  %s2490_s1, 16384, %s32_s19, [#allocation6], %s2373_s30, %s2373_s30, %s2374_s6  }
  0x15   :  { %s2275_s11 = scalar_lea.hbm %s2489_s0, 1024 }
  0x16   :  { %p2276_p8 = scmp.ne.s32.totalorder %s2489_s0, %s2275_s11  ;;  %p2279_p9 = scmp.lt.u32.totalorder %s2275_s11, %s2489_s0 }
  0x18   :  { %p2281_p10 = pnand %p2279_p9, %p2276_p8 }
  0x1a   :  { %2284 = shalt.err (!%p2281_p10)
}
  0x1b   :  { %s2285_s16 = scalar_lea.vmem %s2413_s21, 1024  ;;  %p2290_p12 = scmp.lt.s32.totalorder %s2413_s21, %s2413_s21 }
  0x1c   :  { %p2286_p11 = scmp.ne.s32.totalorder %s2413_s21, %s2285_s16  ;;  %p2291_p13 = scmp.lt.s32.totalorder %s2285_s16, %s2285_s16 }
  0x1e   :  { %p2292_p0 = por %p2291_p13, %p2290_p12 }
  0x20   :  { %p2293_p1 = pnand %p2292_p0, %p2286_p11 }
  0x22   :  { %2296 = shalt.err (!%p2293_p1)
}
  0x23   :  { %25 = dma.hbm_to_vmem [thread:$0]  %s2489_s0, 1024, %s2413_s21, [#allocation3], %s2373_s30, %s2373_s30, %s2374_s6  }
  0x24   :  { %s2375_s18 = smov [#allocation7]   ;;  %s2297_s23 = scalar_lea.hbm %s2491_s2, 8192 }
  0x25   :  { %s43_s19 = sshll.u32 %s2375_s18, 4  ;;  %p2298_p2 = scmp.ne.s32.totalorder %s2491_s2, %s2297_s23  ;;  %s44_s19 = int_to_ptr.vmem [resolvable:$true] %s43_s19 }
  0x26   :  { %p2301_p3 = scmp.lt.u32.totalorder %s2297_s23, %s2491_s2 }
  0x28   :  { %p2303_p4 = pnand %p2301_p3, %p2298_p2 }
  0x2a   :  { %2306 = shalt.err (!%p2303_p4)
}
  0x2b   :  { %s2307_s28 = scalar_lea.vmem %s44_s19, 8192  ;;  %p2312_p6 = scmp.lt.s32.totalorder %s44_s19, %s44_s19 }
  0x2c   :  { %p2308_p5 = scmp.ne.s32.totalorder %s44_s19, %s2307_s28  ;;  %p2313_p7 = scmp.lt.s32.totalorder %s2307_s28, %s2307_s28 }
  0x2e   :  { %p2314_p8 = por %p2313_p7, %p2312_p6 }
  0x30   :  { %p2315_p9 = pnand %p2314_p8, %p2308_p5 }
  0x32   :  { %2318 = shalt.err (!%p2315_p9)
}
  0x33   :  { %s2376_s0 = smov 128   ;;  %s2377_s21 = smov 8  }
  0x34   :  { %49 = dma.hbm_to_vmem [thread:$0]  %s2491_s2, 8192, %s44_s19, [#allocation6], %s2376_s0, %s2376_s0, %s2377_s21  }
  0x35   :  { %s2378_s6 = smov [#allocation8]   ;;  %s2319_s10 = scalar_lea.hbm %s2492_s3, 8192 }
  0x36   :  { %s55_s7 = sshll.u32 %s2378_s6, 4  ;;  %p2320_p10 = scmp.ne.s32.totalorder %s2492_s3, %s2319_s10  ;;  %s56_s7 = int_to_ptr.vmem [resolvable:$true] %s55_s7 }
  0x37   :  { %p2323_p11 = scmp.lt.u32.totalorder %s2319_s10, %s2492_s3 }
  0x39   :  { %p2325_p12 = pnand %p2323_p11, %p2320_p10 }
  0x3b   :  { %2328 = shalt.err (!%p2325_p12)
}
  0x3c   :  { %s2329_s15 = scalar_lea.vmem %s56_s7, 8192  ;;  %p2334_p0 = scmp.lt.s32.totalorder %s56_s7, %s56_s7 }
  0x3d   :  { %p2330_p13 = scmp.ne.s32.totalorder %s56_s7, %s2329_s15  ;;  %p2335_p1 = scmp.lt.s32.totalorder %s2329_s15, %s2329_s15 }
  0x3f   :  { %p2336_p2 = por %p2335_p1, %p2334_p0 }
  0x41   :  { %p2337_p3 = pnand %p2336_p2, %p2330_p13 }
  0x43   :  { %2340 = shalt.err (!%p2337_p3)
}
  0x44   :  { %s2379_s2 = smov 512   ;;  %s2380_s16 = smov 32  }
  0x45   :  { %61 = dma.hbm_to_vmem [thread:$0]  %s2492_s3, 8192, %s56_s7, [#allocation9], %s2379_s2, %s2379_s2, %s2380_s16  }
  0x46   :  { %2363 = dma.done.wait [#allocation3], 1024  }
  0x47   :  { %2364 = vsyncadd [#allocation3], 4294966272 }
  0x48   :  { %2365 = dma.done.wait [#allocation6], 24576  }
  0x49   :  { %2366 = vsyncadd [#allocation6], 4294942720 }
  0x4a   :  { %2367 = dma.done.wait [#allocation9], 8192  }
  0x4b   :  { %2368 = vsyncadd [#allocation9], 4294959104  ;;  %v2041_v0 = vld [vmem:[#allocation5 + $0x4] ss:$16 sps:$4 sm:$0xff]   ;;  %v2043_v1 = vld [vmem:[#allocation5 + $0xc] ss:$16 sps:$4 sm:$0xff]  }
  0x4c   :  { %892 = vmatprep.subr.bf16.mxu0 %v2041_v0  ;;  %v2045_v2 = vld [vmem:[#allocation5] ss:$16 sps:$4 sm:$0xff]   ;;  %v2046_v3 = vld [vmem:[#allocation5 + $0x8] ss:$16 sps:$4 sm:$0xff]   ;;  %998 = vmatprep.subr.bf16.mxu1 %v2043_v1  ;;  %v2047_v4 = vld [vmem:[#allocation5 + $0x24] ss:$16 sps:$4 sm:$0xff]  }
  0x4d   :  { %893 = vmatpush1.bf16.msra.mxu0 %v2045_v2  ;;  %999 = vmatpush1.bf16.msra.mxu1 %v2046_v3  ;;  %v2049_v5 = vld [vmem:[#allocation5 + $0x2c] ss:$16 sps:$4 sm:$0xff]   ;;  %v2051_v6 = vld [vmem:[#allocation5 + $0x20] ss:$16 sps:$4 sm:$0xff]   ;;  %v2052_v7 = vld [vmem:[#allocation5 + $0x28] ss:$16 sps:$4 sm:$0xff]  }
  0x4e   :  { %894 = vmatprep.subr.bf16.mxu0 %v2047_v4  ;;  %1000 = vmatprep.subr.bf16.mxu1 %v2049_v5  ;;  %v2053_v8 = vld [vmem:[#allocation5 + $0x44] ss:$16 sps:$4 sm:$0xff]   ;;  %v2055_v9 = vld [vmem:[#allocation5 + $0x4c] ss:$16 sps:$4 sm:$0xff]   ;;  %v2057_v10 = vld [vmem:[#allocation5 + $0x40] ss:$16 sps:$4 sm:$0xff]  }
  0x4f   :  { %v2058_v11 = vld [vmem:[#allocation5 + $0x48] ss:$16 sps:$4 sm:$0xff]   ;;  %v2059_v12 = vld [vmem:[#allocation5 + $0x64] ss:$16 sps:$4 sm:$0xff]   ;;  %v2061_v13 = vld [vmem:[#allocation5 + $0x6c] ss:$16 sps:$4 sm:$0xff]  }
  0x50   :  { %v2063_v14 = vld [vmem:[#allocation5 + $0x60] ss:$16 sps:$4 sm:$0xff]   ;;  %v2064_v15 = vld [vmem:[#allocation5 + $0x68] ss:$16 sps:$4 sm:$0xff]   ;;  %v2065_v16 = vld [vmem:[#allocation5 + $0x84] ss:$16 sps:$4 sm:$0xff]  }
  0x51   :  { %895 = vmatpush1.bf16.msra.mxu0 %v2051_v6  ;;  %1001 = vmatpush1.bf16.msra.mxu1 %v2052_v7  ;;  %v2067_v17 = vld [vmem:[#allocation5 + $0x8c] ss:$16 sps:$4 sm:$0xff]   ;;  %v2069_v18 = vld [vmem:[#allocation5 + $0x80] ss:$16 sps:$4 sm:$0xff]   ;;  %v2070_v19 = vld [vmem:[#allocation5 + $0x88] ss:$16 sps:$4 sm:$0xff]  }
  0x52   :  { %896 = vmatprep.subr.bf16.mxu0 %v2053_v8  ;;  %1002 = vmatprep.subr.bf16.mxu1 %v2055_v9  ;;  %v2071_v20 = vld [vmem:[#allocation5 + $0xa4] ss:$16 sps:$4 sm:$0xff]   ;;  %v2073_v21 = vld [vmem:[#allocation5 + $0xac] ss:$16 sps:$4 sm:$0xff]   ;;  %v2075_v22 = vld [vmem:[#allocation5 + $0xa0] ss:$16 sps:$4 sm:$0xff]  }
  0x53   :  { %v2076_v23 = vld [vmem:[#allocation5 + $0xa8] ss:$16 sps:$4 sm:$0xff]   ;;  %v2077_v24 = vld [vmem:[#allocation5 + $0xc4] ss:$16 sps:$4 sm:$0xff]   ;;  %v2079_v25 = vld [vmem:[#allocation5 + $0xcc] ss:$16 sps:$4 sm:$0xff]  }
  0x54   :  { %v2081_v26 = vld [vmem:[#allocation5 + $0xc0] ss:$16 sps:$4 sm:$0xff]   ;;  %v2082_v27 = vld [vmem:[#allocation5 + $0xc8] ss:$16 sps:$4 sm:$0xff]   ;;  %v2083_v28 = vld [vmem:[#allocation5 + $0xe4] ss:$16 sps:$4 sm:$0xff]  }
  0x55   :  { %897 = vmatpush1.bf16.msra.mxu0 %v2057_v10  ;;  %1003 = vmatpush1.bf16.msra.mxu1 %v2058_v11  ;;  %v2085_v29 = vld [vmem:[#allocation5 + $0xec] ss:$16 sps:$4 sm:$0xff]   ;;  %v2087_v30 = vld [vmem:[#allocation5 + $0xe0] ss:$16 sps:$4 sm:$0xff]   ;;  %v2088_v31 = vld [vmem:[#allocation5 + $0xe8] ss:$16 sps:$4 sm:$0xff]  }
  0x56   :  { %898 = vmatprep.subr.bf16.mxu0 %v2059_v12  ;;  %1004 = vmatprep.subr.bf16.mxu1 %v2061_v13  ;;  %v2089_v32 = vld [vmem:[#allocation5 + $0x104] ss:$16 sps:$4 sm:$0xff]   ;;  %v2091_v33 = vld [vmem:[#allocation5 + $0x10c] ss:$16 sps:$4 sm:$0xff]   ;;  %v2093_v34 = vld [vmem:[#allocation5 + $0x100] ss:$16 sps:$4 sm:$0xff]  }
  0x57   :  { %v2094_v35 = vld [vmem:[#allocation5 + $0x108] ss:$16 sps:$4 sm:$0xff]   ;;  %v2095_v36 = vld [vmem:[#allocation5 + $0x124] ss:$16 sps:$4 sm:$0xff]   ;;  %v2097_v37 = vld [vmem:[#allocation5 + $0x12c] ss:$16 sps:$4 sm:$0xff]  }
  0x58   :  { %v2099_v38 = vld [vmem:[#allocation5 + $0x120] ss:$16 sps:$4 sm:$0xff]   ;;  %v2100_v39 = vld [vmem:[#allocation5 + $0x128] ss:$16 sps:$4 sm:$0xff]   ;;  %v2101_v40 = vld [vmem:[#allocation5 + $0x144] ss:$16 sps:$4 sm:$0xff]  }
  0x59   :  { %899 = vmatpush1.bf16.msra.mxu0 %v2063_v14  ;;  %1005 = vmatpush1.bf16.msra.mxu1 %v2064_v15  ;;  %v2103_v41 = vld [vmem:[#allocation5 + $0x14c] ss:$16 sps:$4 sm:$0xff]   ;;  %v2105_v42 = vld [vmem:[#allocation5 + $0x140] ss:$16 sps:$4 sm:$0xff]   ;;  %v2106_v43 = vld [vmem:[#allocation5 + $0x148] ss:$16 sps:$4 sm:$0xff]  }
  0x5a   :  { %900 = vmatprep.subr.bf16.mxu0 %v2065_v16  ;;  %1006 = vmatprep.subr.bf16.mxu1 %v2067_v17  ;;  %v2107_v44 = vld [vmem:[#allocation5 + $0x164] ss:$16 sps:$4 sm:$0xff]   ;;  %v2109_v45 = vld [vmem:[#allocation5 + $0x16c] ss:$16 sps:$4 sm:$0xff]   ;;  %v2111_v46 = vld [vmem:[#allocation5 + $0x160] ss:$16 sps:$4 sm:$0xff]  }
  0x5b   :  { %v2112_v47 = vld [vmem:[#allocation5 + $0x168] ss:$16 sps:$4 sm:$0xff]   ;;  %v2139_v48 = vld [vmem:[#allocation2 + $0x4] ss:$16 sps:$4 sm:$0xff]   ;;  %v2115_v50 = vld [vmem:[#allocation5 + $0x18c] ss:$16 sps:$4 sm:$0xff]  }
  0x5c   :  { %v2113_v49 = vld [vmem:[#allocation5 + $0x184] ss:$16 sps:$4 sm:$0xff]   ;;  %924 = vmatprep.mubr.bf16.mxu0 %v2139_v48  ;;  %1030 = vmatprep.mubr.bf16.mxu1 %v2139_v48  ;;  %v2117_v51 = vld [vmem:[#allocation5 + $0x180] ss:$16 sps:$4 sm:$0xff]   ;;  %v2118_v52 = vld [vmem:[#allocation5 + $0x188] ss:$16 sps:$4 sm:$0xff]  }
  0x5d   :  { %901 = vmatpush1.bf16.msra.mxu0 %v2069_v18  ;;  %1007 = vmatpush1.bf16.msra.mxu1 %v2070_v19  ;;  %v2119_v53 = vld [vmem:[#allocation5 + $0x1a4] ss:$16 sps:$4 sm:$0xff]   ;;  %v2121_v54 = vld [vmem:[#allocation5 + $0x1ac] ss:$16 sps:$4 sm:$0xff]   ;;  %v2123_v55 = vld [vmem:[#allocation5 + $0x1a0] ss:$16 sps:$4 sm:$0xff]  }
  0x5e   :  { %902 = vmatprep.subr.bf16.mxu0 %v2071_v20  ;;  %1008 = vmatprep.subr.bf16.mxu1 %v2073_v21  ;;  %v2124_v56 = vld [vmem:[#allocation5 + $0x1a8] ss:$16 sps:$4 sm:$0xff]   ;;  %v2125_v57 = vld [vmem:[#allocation5 + $0x1c4] ss:$16 sps:$4 sm:$0xff]   ;;  %v2127_v58 = vld [vmem:[#allocation5 + $0x1cc] ss:$16 sps:$4 sm:$0xff]  }
  0x5f   :  { %v2129_v59 = vld [vmem:[#allocation5 + $0x1c0] ss:$16 sps:$4 sm:$0xff]   ;;  %v2130_v60 = vld [vmem:[#allocation5 + $0x1c8] ss:$16 sps:$4 sm:$0xff]   ;;  %v2131_v61 = vld [vmem:[#allocation5 + $0x1e4] ss:$16 sps:$4 sm:$0xff]  }
  0x60   :  { %v2133_v62 = vld [vmem:[#allocation5 + $0x1ec] ss:$16 sps:$4 sm:$0xff]   ;;  %v2135_v63 = vld [vmem:[#allocation5 + $0x1e0] ss:$16 sps:$4 sm:$0xff]   ;;  %v2136_v0 = vld [vmem:[#allocation5 + $0x1e8] ss:$16 sps:$4 sm:$0xff]  }
  0x61   :  { %903 = vmatpush1.bf16.msra.mxu0 %v2075_v22  ;;  %1009 = vmatpush1.bf16.msra.mxu1 %v2076_v23  ;;  %v2142_v1 = vld [vmem:[#allocation5 + $0x204] ss:$16 sps:$4 sm:$0xff]   ;;  %v2145_v2 = vld [vmem:[#allocation5 + $0x20c] ss:$16 sps:$4 sm:$0xff]   ;;  %v2137_v3 = vld [vmem:[#allocation2] ss:$16 sps:$4 sm:$0xff]  }
  0x62   :  { %904 = vmatprep.subr.bf16.mxu0 %v2077_v24  ;;  %1010 = vmatprep.subr.bf16.mxu1 %v2079_v25  ;;  %v2140_v4 = vld [vmem:[#allocation5 + $0x200] ss:$16 sps:$4 sm:$0xff]   ;;  %v2143_v5 = vld [vmem:[#allocation5 + $0x208] ss:$16 sps:$4 sm:$0xff]   ;;  %v2148_v6 = vld [vmem:[#allocation5 + $0x224] ss:$16 sps:$4 sm:$0xff]  }
  0x63   :  { %v2151_v7 = vld [vmem:[#allocation5 + $0x22c] ss:$16 sps:$4 sm:$0xff]   ;;  %v2146_v8 = vld [vmem:[#allocation5 + $0x220] ss:$16 sps:$4 sm:$0xff]   ;;  %v2149_v9 = vld [vmem:[#allocation5 + $0x228] ss:$16 sps:$4 sm:$0xff]  }
  0x64   :  { %v2154_v10 = vld [vmem:[#allocation5 + $0x244] ss:$16 sps:$4 sm:$0xff]   ;;  %v2157_v11 = vld [vmem:[#allocation5 + $0x24c] ss:$16 sps:$4 sm:$0xff]   ;;  %v2152_v12 = vld [vmem:[#allocation5 + $0x240] ss:$16 sps:$4 sm:$0xff]  }
  0x65   :  { %905 = vmatpush1.bf16.msra.mxu0 %v2081_v26  ;;  %1011 = vmatpush1.bf16.msra.mxu1 %v2082_v27  ;;  %v2155_v13 = vld [vmem:[#allocation5 + $0x248] ss:$16 sps:$4 sm:$0xff]   ;;  %v2160_v14 = vld [vmem:[#allocation5 + $0x264] ss:$16 sps:$4 sm:$0xff]   ;;  %v2163_v15 = vld [vmem:[#allocation5 + $0x26c] ss:$16 sps:$4 sm:$0xff]  }
  0x66   :  { %906 = vmatprep.subr.bf16.mxu0 %v2083_v28  ;;  %1012 = vmatprep.subr.bf16.mxu1 %v2085_v29  ;;  %v2158_v16 = vld [vmem:[#allocation5 + $0x260] ss:$16 sps:$4 sm:$0xff]   ;;  %v2161_v17 = vld [vmem:[#allocation5 + $0x268] ss:$16 sps:$4 sm:$0xff]   ;;  %v2166_v18 = vld [vmem:[#allocation5 + $0x284] ss:$16 sps:$4 sm:$0xff]  }
  0x67   :  { %v2169_v19 = vld [vmem:[#allocation5 + $0x28c] ss:$16 sps:$4 sm:$0xff]   ;;  %v2164_v20 = vld [vmem:[#allocation5 + $0x280] ss:$16 sps:$4 sm:$0xff]   ;;  %v2167_v21 = vld [vmem:[#allocation5 + $0x288] ss:$16 sps:$4 sm:$0xff]  }
  0x68   :  { %v2172_v22 = vld [vmem:[#allocation5 + $0x2a4] ss:$16 sps:$4 sm:$0xff]   ;;  %v2175_v23 = vld [vmem:[#allocation5 + $0x2ac] ss:$16 sps:$4 sm:$0xff]   ;;  %v2170_v24 = vld [vmem:[#allocation5 + $0x2a0] ss:$16 sps:$4 sm:$0xff]  }
  0x69   :  { %907 = vmatpush1.bf16.msra.mxu0 %v2087_v30  ;;  %1013 = vmatpush1.bf16.msra.mxu1 %v2088_v31  ;;  %v2224_v25 = vld [vmem:[#allocation2 + $0x24] ss:$16 sps:$4 sm:$0xff]   ;;  %v2173_v26 = vld [vmem:[#allocation5 + $0x2a8] ss:$16 sps:$4 sm:$0xff]   ;;  %v2226_v27 = vld [vmem:[#allocation2 + $0x20] ss:$16 sps:$4 sm:$0xff]  }
  0x6a   :  { %908 = vmatprep.subr.bf16.mxu0 %v2089_v32  ;;  %1014 = vmatprep.subr.bf16.mxu1 %v2091_v33  ;;  %v2178_v28 = vld [vmem:[#allocation5 + $0x2c4] ss:$16 sps:$4 sm:$0xff]   ;;  %v2181_v29 = vld [vmem:[#allocation5 + $0x2cc] ss:$16 sps:$4 sm:$0xff]   ;;  %v2176_v30 = vld [vmem:[#allocation5 + $0x2c0] ss:$16 sps:$4 sm:$0xff]  }
  0x6b   :  { %v2179_v31 = vld [vmem:[#allocation5 + $0x2c8] ss:$16 sps:$4 sm:$0xff]   ;;  %v2184_v32 = vld [vmem:[#allocation5 + $0x2e4] ss:$16 sps:$4 sm:$0xff]   ;;  %v2187_v33 = vld [vmem:[#allocation5 + $0x2ec] ss:$16 sps:$4 sm:$0xff]  }
  0x6c   :  { %v2203_v48 = vld [vmem:[#allocation5 + $0x348] ss:$16 sps:$4 sm:$0xff]  }
  0x6d   :  { %909 = vmatpush1.bf16.msra.mxu0 %v2093_v34  ;;  %1015 = vmatpush1.bf16.msra.mxu1 %v2094_v35  ;;  %v2241_v34 = vld [vmem:[#allocation2 + $0xc] ss:$16 sps:$4 sm:$0xff]   ;;  %v2182_v35 = vld [vmem:[#allocation5 + $0x2e0] ss:$16 sps:$4 sm:$0xff]  }
  0x6e   :  { %910 = vmatprep.subr.bf16.mxu0 %v2095_v36  ;;  %1016 = vmatprep.subr.bf16.mxu1 %v2097_v37  ;;  %v2185_v36 = vld [vmem:[#allocation5 + $0x2e8] ss:$16 sps:$4 sm:$0xff]   ;;  %v2190_v37 = vld [vmem:[#allocation5 + $0x304] ss:$16 sps:$4 sm:$0xff]  }
  0x71   :  { %911 = vmatpush1.bf16.msra.mxu0 %v2099_v38  ;;  %1017 = vmatpush1.bf16.msra.mxu1 %v2100_v39  ;;  %v2193_v38 = vld [vmem:[#allocation5 + $0x30c] ss:$16 sps:$4 sm:$0xff]   ;;  %v2188_v39 = vld [vmem:[#allocation5 + $0x300] ss:$16 sps:$4 sm:$0xff]  }
  0x72   :  { %912 = vmatprep.subr.bf16.mxu0 %v2101_v40  ;;  %1018 = vmatprep.subr.bf16.mxu1 %v2103_v41  ;;  %v2191_v40 = vld [vmem:[#allocation5 + $0x308] ss:$16 sps:$4 sm:$0xff]   ;;  %v2196_v41 = vld [vmem:[#allocation5 + $0x324] ss:$16 sps:$4 sm:$0xff]  }
  0x75   :  { %913 = vmatpush1.bf16.msra.mxu0 %v2105_v42  ;;  %1019 = vmatpush1.bf16.msra.mxu1 %v2106_v43  ;;  %v2199_v42 = vld [vmem:[#allocation5 + $0x32c] ss:$16 sps:$4 sm:$0xff]   ;;  %v2194_v43 = vld [vmem:[#allocation5 + $0x320] ss:$16 sps:$4 sm:$0xff]  }
  0x76   :  { %914 = vmatprep.subr.bf16.mxu0 %v2107_v44  ;;  %1020 = vmatprep.subr.bf16.mxu1 %v2109_v45  ;;  %v2197_v44 = vld [vmem:[#allocation5 + $0x328] ss:$16 sps:$4 sm:$0xff]   ;;  %v2202_v45 = vld [vmem:[#allocation5 + $0x344] ss:$16 sps:$4 sm:$0xff]  }
  0x79   :  { %915 = vmatpush1.bf16.msra.mxu0 %v2111_v46  ;;  %1021 = vmatpush1.bf16.msra.mxu1 %v2112_v47  ;;  %v2205_v46 = vld [vmem:[#allocation5 + $0x34c] ss:$16 sps:$4 sm:$0xff]   ;;  %v2200_v47 = vld [vmem:[#allocation5 + $0x340] ss:$16 sps:$4 sm:$0xff]  }
  0x7a   :  { %916 = vmatprep.subr.bf16.mxu0 %v2113_v49  ;;  %1022 = vmatprep.subr.bf16.mxu1 %v2115_v50  ;;  %v2208_v49 = vld [vmem:[#allocation5 + $0x364] ss:$16 sps:$4 sm:$0xff]   ;;  %v2211_v50 = vld [vmem:[#allocation5 + $0x36c] ss:$16 sps:$4 sm:$0xff]  }
  0x7d   :  { %917 = vmatpush1.bf16.msra.mxu0 %v2117_v51  ;;  %1023 = vmatpush1.bf16.msra.mxu1 %v2118_v52  ;;  %v2206_v51 = vld [vmem:[#allocation5 + $0x360] ss:$16 sps:$4 sm:$0xff]   ;;  %v2209_v52 = vld [vmem:[#allocation5 + $0x368] ss:$16 sps:$4 sm:$0xff]  }
  0x7e   :  { %918 = vmatprep.subr.bf16.mxu0 %v2119_v53  ;;  %1024 = vmatprep.subr.bf16.mxu1 %v2121_v54  ;;  %v2214_v53 = vld [vmem:[#allocation5 + $0x384] ss:$16 sps:$4 sm:$0xff]   ;;  %v2217_v54 = vld [vmem:[#allocation5 + $0x38c] ss:$16 sps:$4 sm:$0xff]  }
  0x81   :  { %919 = vmatpush1.bf16.msra.mxu0 %v2123_v55  ;;  %1025 = vmatpush1.bf16.msra.mxu1 %v2124_v56  ;;  %v2212_v55 = vld [vmem:[#allocation5 + $0x380] ss:$16 sps:$4 sm:$0xff]   ;;  %v2215_v56 = vld [vmem:[#allocation5 + $0x388] ss:$16 sps:$4 sm:$0xff]  }
  0x82   :  { %920 = vmatprep.subr.bf16.mxu0 %v2125_v57  ;;  %1026 = vmatprep.subr.bf16.mxu1 %v2127_v58  ;;  %v2220_v57 = vld [vmem:[#allocation5 + $0x3a4] ss:$16 sps:$4 sm:$0xff]   ;;  %v2223_v58 = vld [vmem:[#allocation5 + $0x3ac] ss:$16 sps:$4 sm:$0xff]  }
  0x85   :  { %921 = vmatpush1.bf16.msra.mxu0 %v2129_v59  ;;  %1027 = vmatpush1.bf16.msra.mxu1 %v2130_v60  ;;  %v2218_v59 = vld [vmem:[#allocation5 + $0x3a0] ss:$16 sps:$4 sm:$0xff]   ;;  %v2221_v60 = vld [vmem:[#allocation5 + $0x3a8] ss:$16 sps:$4 sm:$0xff]  }
  0x86   :  { %922 = vmatprep.subr.bf16.mxu0 %v2131_v61  ;;  %1028 = vmatprep.subr.bf16.mxu1 %v2133_v62  ;;  %v2229_v61 = vld [vmem:[#allocation5 + $0x3c4] ss:$16 sps:$4 sm:$0xff]   ;;  %v2232_v62 = vld [vmem:[#allocation5 + $0x3cc] ss:$16 sps:$4 sm:$0xff]  }
  0x89   :  { %923 = vmatpush1.bf16.msra.mxu0 %v2135_v63  ;;  %1029 = vmatpush1.bf16.msra.mxu1 %v2136_v0  ;;  %v2227_v63 = vld [vmem:[#allocation5 + $0x3c0] ss:$16 sps:$4 sm:$0xff]   ;;  %v2230_v0 = vld [vmem:[#allocation5 + $0x3c8] ss:$16 sps:$4 sm:$0xff]  }
  0x8a   :  { %945 = vmatprep.subr.bf16.mxu0 %v2142_v1  ;;  %1051 = vmatprep.subr.bf16.mxu1 %v2145_v2  ;;  %v2235_v1 = vld [vmem:[#allocation5 + $0x3e4] ss:$16 sps:$4 sm:$0xff]   ;;  %v2238_v2 = vld [vmem:[#allocation5 + $0x3ec] ss:$16 sps:$4 sm:$0xff]  }
  0x8c   :  { %925 = vmatmul.mubr.bf16.vlgmr.msra.gmra.mrb[0].mxu0 %v2137_v3  ;;  %1031 = vmatmul.mubr.bf16.vlgmr.msra.gmra.mrb[0].mxu1 %v2137_v3  ;;  %v1136_v3 = vld [vmem:[#allocation7 + $0x80] sm:$0xff] }
  0x8d   :  { %946 = vmatpush1.bf16.msra.mxu0 %v2140_v4  ;;  %1052 = vmatpush1.bf16.msra.mxu1 %v2143_v5  ;;  %v1137_v4 = vld [vmem:[#allocation7 + $0x88] sm:$0xff]  ;;  %v1168_v5 = vld [vmem:[#allocation7 + $0x180] sm:$0xff] }
  0x8e   :  { %947 = vmatprep.subr.bf16.mxu0 %v2148_v6  ;;  %1053 = vmatprep.subr.bf16.mxu1 %v2151_v7  ;;  %v1169_v6 = vld [vmem:[#allocation7 + $0x188] sm:$0xff]  ;;  %v2233_v7 = vld [vmem:[#allocation5 + $0x3e0] ss:$16 sps:$4 sm:$0xff]  }
  0x8f   :  { %934 = vmatprep.mubr.bf16.mxu0 %v2224_v25  ;;  %1040 = vmatprep.mubr.bf16.mxu1 %v2224_v25 }
  0x91   :  { %948 = vmatpush1.bf16.msra.mxu0 %v2146_v8  ;;  %1054 = vmatpush1.bf16.msra.mxu1 %v2149_v9  ;;  %v2236_v8 = vld [vmem:[#allocation5 + $0x3e8] ss:$16 sps:$4 sm:$0xff]  }
  0x92   :  { %949 = vmatprep.subr.bf16.mxu0 %v2154_v10  ;;  %1055 = vmatprep.subr.bf16.mxu1 %v2157_v11  ;;  %v2239_v9 = vld [vmem:[#allocation2 + $0x8] ss:$16 sps:$4 sm:$0xff]   ;;  %v1885_v10 = vpack.c.bf16 %v1137_v4, %v1136_v3  ;;  %v1917_v11 = vpack.c.bf16 %v1169_v6, %v1168_v5  ;;  %v1178_v4 = vld [vmem:[#allocation7 + $0x1d0] sm:$0xff] }
  0x93   :  { %v1147_v3 = vld [vmem:[#allocation7 + $0xd8] sm:$0xff] }
  0x94   :  { %935 = vmatmul.mubr.bf16.gmra.mrb[4].mxu0 %v2226_v27  ;;  %1041 = vmatmul.mubr.bf16.gmra.mrb[4].mxu1 %v2226_v27  ;;  %v1154_v27 = vld [vmem:[#allocation7 + $0x110] sm:$0xff]  ;;  %v1179_v5 = vld [vmem:[#allocation7 + $0x1d8] sm:$0xff] }
  0x95   :  { %950 = vmatpush1.bf16.msra.mxu0 %v2152_v12  ;;  %1056 = vmatpush1.bf16.msra.mxu1 %v2155_v13  ;;  %v1120_v12 = vld [vmem:[#allocation7] sm:$0xff]  ;;  %v1121_v13 = vld [vmem:[#allocation7 + $0x8] sm:$0xff] }
  0x96   :  { %951 = vmatprep.subr.bf16.mxu0 %v2160_v14  ;;  %1057 = vmatprep.subr.bf16.mxu1 %v2163_v15  ;;  %v1152_v14 = vld [vmem:[#allocation7 + $0x100] sm:$0xff]  ;;  %v1153_v15 = vld [vmem:[#allocation7 + $0x108] sm:$0xff] }
  0x97   :  { %977 = vmatprep.mubr.bf16.mxu0 %v2241_v34  ;;  %1083 = vmatprep.mubr.bf16.mxu1 %v2241_v34 }
  0x99   :  { %952 = vmatpush1.bf16.msra.mxu0 %v2158_v16  ;;  %1058 = vmatpush1.bf16.msra.mxu1 %v2161_v17  ;;  %v1138_v16 = vld [vmem:[#allocation7 + $0x90] sm:$0xff]  ;;  %v1139_v17 = vld [vmem:[#allocation7 + $0x98] sm:$0xff] }
  0x9a   :  { %953 = vmatprep.subr.bf16.mxu0 %v2166_v18  ;;  %1059 = vmatprep.subr.bf16.mxu1 %v2169_v19  ;;  %v1170_v18 = vld [vmem:[#allocation7 + $0x190] sm:$0xff]  ;;  %v1171_v19 = vld [vmem:[#allocation7 + $0x198] sm:$0xff]  ;;  %v1889_v25 = vpack.c.bf16 %v1139_v17, %v1138_v16  ;;  %v1180_v16 = vld [vmem:[#allocation7 + $0x1e0] sm:$0xff] }
  0x9b   :  { %v1181_v17 = vld [vmem:[#allocation7 + $0x1e8] sm:$0xff] }
  0x9d   :  { %954 = vmatpush1.bf16.msra.mxu0 %v2164_v20  ;;  %1060 = vmatpush1.bf16.msra.mxu1 %v2167_v21  ;;  %v2242_v20 = vld [vmem:[#allocation2 + $0x2c] ss:$16 sps:$4 sm:$0xff]   ;;  %v1887_v21 = vpack.c.bf16 %v1121_v13, %v1120_v12  ;;  %v1162_v12 = vld [vmem:[#allocation7 + $0x150] sm:$0xff] }
  0x9e   :  { %955 = vmatprep.subr.bf16.mxu0 %v2172_v22  ;;  %1061 = vmatprep.subr.bf16.mxu1 %v2175_v23  ;;  %v1919_v22 = vpack.c.bf16 %v1153_v15, %v1152_v14  ;;  %v1122_v23 = vld [vmem:[#allocation7 + $0x10] sm:$0xff]  ;;  %v1163_v13 = vld [vmem:[#allocation7 + $0x158] sm:$0xff]  ;;  %v1148_v14 = vld [vmem:[#allocation7 + $0xe0] sm:$0xff] }
  0x9f   :  { %v1149_v15 = vld [vmem:[#allocation7 + $0xe8] sm:$0xff] }
  0xa1   :  { %956 = vmatpush1.bf16.msra.mxu0 %v2170_v24  ;;  %1062 = vmatpush1.bf16.msra.mxu1 %v2173_v26  ;;  %v1123_v24 = vld [vmem:[#allocation7 + $0x18] sm:$0xff]  ;;  %v1921_v26 = vpack.c.bf16 %v1171_v19, %v1170_v18  ;;  %v1939_v19 = vpack.c.bf16 %v1163_v13, %v1162_v12  ;;  %v1379_v13 = vld [vmem:[#allocation8 + $0x88] sm:$0xff] }
  0xa2   :  { %957 = vmatprep.subr.bf16.mxu0 %v2178_v28  ;;  %1063 = vmatprep.subr.bf16.mxu1 %v2181_v29  ;;  %v1155_v28 = vld [vmem:[#allocation7 + $0x118] sm:$0xff]  ;;  %v1140_v29 = vld [vmem:[#allocation7 + $0xa0] sm:$0xff]  ;;  %v1891_v34 = vpack.c.bf16 %v1123_v24, %v1122_v23  ;;  %v1133_v23 = vld [vmem:[#allocation7 + $0x68] sm:$0xff] }
  0xa3   :  { %v1164_v24 = vld [vmem:[#allocation7 + $0x160] sm:$0xff] }
  0xa5   :  { %958 = vmatpush1.bf16.msra.mxu0 %v2176_v30  ;;  %1064 = vmatpush1.bf16.msra.mxu1 %v2179_v31  ;;  %v1141_v30 = vld [vmem:[#allocation7 + $0xa8] sm:$0xff]  ;;  %v1172_v31 = vld [vmem:[#allocation7 + $0x1a0] sm:$0xff] }
  0xa6   :  { %959 = vmatprep.subr.bf16.mxu0 %v2184_v32  ;;  %1065 = vmatprep.subr.bf16.mxu1 %v2187_v33  ;;  %v1173_v32 = vld [vmem:[#allocation7 + $0x1a8] sm:$0xff] }
  0xa7   :  { %v2244_v33 = vld [vmem:[#allocation2 + $0x28] ss:$16 sps:$4 sm:$0xff]  }
  0xa9   :  { %960 = vmatpush1.bf16.msra.mxu0 %v2182_v35  ;;  %1066 = vmatpush1.bf16.msra.mxu1 %v2185_v36  ;;  %v1923_v35 = vpack.c.bf16 %v1155_v28, %v1154_v27  ;;  %v1124_v36 = vld [vmem:[#allocation7 + $0x20] sm:$0xff]  ;;  %v1150_v28 = vld [vmem:[#allocation7 + $0xf0] sm:$0xff] }
  0xaa   :  { %961 = vmatprep.subr.bf16.mxu0 %v2190_v37  ;;  %1067 = vmatprep.subr.bf16.mxu1 %v2193_v38  ;;  %v1125_v37 = vld [vmem:[#allocation7 + $0x28] sm:$0xff]  ;;  %v1893_v38 = vpack.c.bf16 %v1141_v30, %v1140_v29  ;;  %v1151_v29 = vld [vmem:[#allocation7 + $0xf8] sm:$0xff]  ;;  %v1182_v30 = vld [vmem:[#allocation7 + $0x1f0] sm:$0xff] }
  0xad   :  { %962 = vmatpush1.bf16.msra.mxu0 %v2188_v39  ;;  %1068 = vmatpush1.bf16.msra.mxu1 %v2191_v40  ;;  %v1925_v39 = vpack.c.bf16 %v1173_v32, %v1172_v31  ;;  %v1156_v40 = vld [vmem:[#allocation7 + $0x120] sm:$0xff]  ;;  %v1913_v31 = vpack.c.bf16 %v1151_v29, %v1150_v28  ;;  %v1183_v32 = vld [vmem:[#allocation7 + $0x1f8] sm:$0xff] }
  0xae   :  { %963 = vmatprep.subr.bf16.mxu0 %v2196_v41  ;;  %1069 = vmatprep.subr.bf16.mxu1 %v2199_v42  ;;  %v1157_v41 = vld [vmem:[#allocation7 + $0x128] sm:$0xff]  ;;  %v1142_v42 = vld [vmem:[#allocation7 + $0xb0] sm:$0xff] }
  0xb1   :  { %964 = vmatpush1.bf16.msra.mxu0 %v2194_v43  ;;  %1070 = vmatpush1.bf16.msra.mxu1 %v2197_v44  ;;  %v1143_v43 = vld [vmem:[#allocation7 + $0xb8] sm:$0xff]  ;;  %v1174_v44 = vld [vmem:[#allocation7 + $0x1b0] sm:$0xff] }
  0xb2   :  { %965 = vmatprep.subr.bf16.mxu0 %v2202_v45  ;;  %1071 = vmatprep.subr.bf16.mxu1 %v2205_v46  ;;  %v1175_v45 = vld [vmem:[#allocation7 + $0x1b8] sm:$0xff]  ;;  %v1895_v46 = vpack.c.bf16 %v1125_v37, %v1124_v36  ;;  %v1166_v37 = vld [vmem:[#allocation7 + $0x170] sm:$0xff] }
  0xb5   :  { %966 = vmatpush1.bf16.msra.mxu0 %v2200_v47  ;;  %1072 = vmatpush1.bf16.msra.mxu1 %v2203_v48  ;;  %v1927_v47 = vpack.c.bf16 %v1157_v41, %v1156_v40  ;;  %v1126_v48 = vld [vmem:[#allocation7 + $0x30] sm:$0xff]  ;;  %v1363_v40 = vld [vmem:[#allocation8 + $0x8] sm:$0xff] }
  0xb6   :  { %967 = vmatprep.subr.bf16.mxu0 %v2208_v49  ;;  %1073 = vmatprep.subr.bf16.mxu1 %v2211_v50  ;;  %v1127_v49 = vld [vmem:[#allocation7 + $0x38] sm:$0xff]  ;;  %v1897_v50 = vpack.c.bf16 %v1143_v43, %v1142_v42  ;;  %v1367_v41 = vld [vmem:[#allocation8 + $0x28] sm:$0xff] }
  0xb7   :  { %v1365_v42 = vld [vmem:[#allocation8 + $0x18] sm:$0xff]  ;;  %v1949_v43 = vpack.c.bf16 %v1367_v41, %v1363_v40 }
  0xb9   :  { %968 = vmatpush1.bf16.msra.mxu0 %v2206_v51  ;;  %1074 = vmatpush1.bf16.msra.mxu1 %v2209_v52  ;;  %v1929_v51 = vpack.c.bf16 %v1175_v45, %v1174_v44  ;;  %v1158_v52 = vld [vmem:[#allocation7 + $0x130] sm:$0xff]  ;;  %v1369_v44 = vld [vmem:[#allocation8 + $0x38] sm:$0xff] }
  0xba   :  { %969 = vmatprep.subr.bf16.mxu0 %v2214_v53  ;;  %1075 = vmatprep.subr.bf16.mxu1 %v2217_v54  ;;  %v1159_v53 = vld [vmem:[#allocation7 + $0x138] sm:$0xff]  ;;  %v1144_v54 = vld [vmem:[#allocation7 + $0xc0] sm:$0xff]  ;;  %v1981_v45 = vpack.c.bf16 %v1369_v44, %v1365_v42  ;;  %v1387_v44 = vld [vmem:[#allocation8 + $0xc8] sm:$0xff] }
  0xbd   :  { %970 = vmatpush1.bf16.msra.mxu0 %v2212_v55  ;;  %1076 = vmatpush1.bf16.msra.mxu1 %v2215_v56  ;;  %v1145_v55 = vld [vmem:[#allocation7 + $0xc8] sm:$0xff]  ;;  %v1176_v56 = vld [vmem:[#allocation7 + $0x1c0] sm:$0xff] }
  0xbe   :  { %971 = vmatprep.subr.bf16.mxu0 %v2220_v57  ;;  %1077 = vmatprep.subr.bf16.mxu1 %v2223_v58  ;;  %v1177_v57 = vld [vmem:[#allocation7 + $0x1c8] sm:$0xff]  ;;  %v1899_v58 = vpack.c.bf16 %v1127_v49, %v1126_v48  ;;  %v1364_v48 = vld [vmem:[#allocation8 + $0x10] sm:$0xff] }
  0xc1   :  { %972 = vmatpush1.bf16.msra.mxu0 %v2218_v59  ;;  %1078 = vmatpush1.bf16.msra.mxu1 %v2221_v60  ;;  %v1931_v59 = vpack.c.bf16 %v1159_v53, %v1158_v52  ;;  %v1128_v60 = vld [vmem:[#allocation7 + $0x40] sm:$0xff]  ;;  %v1371_v52 = vld [vmem:[#allocation8 + $0x48] sm:$0xff] }
  0xc2   :  { %973 = vmatprep.subr.bf16.mxu0 %v2229_v61  ;;  %1079 = vmatprep.subr.bf16.mxu1 %v2232_v62  ;;  %v1129_v61 = vld [vmem:[#allocation7 + $0x48] sm:$0xff]  ;;  %v1901_v62 = vpack.c.bf16 %v1145_v55, %v1144_v54 }
  0xc3   :  { %v1903_v6 = vpack.c.bf16 %v1129_v61, %v1128_v60  ;;  %v1375_v53 = vld [vmem:[#allocation8 + $0x68] sm:$0xff] }
  0xc5   :  { %974 = vmatpush1.bf16.msra.mxu0 %v2227_v63  ;;  %1080 = vmatpush1.bf16.msra.mxu1 %v2230_v0  ;;  %v1933_v63 = vpack.c.bf16 %v1177_v57, %v1176_v56  ;;  %v1160_v0 = vld [vmem:[#allocation7 + $0x140] sm:$0xff]  ;;  %v1373_v56 = vld [vmem:[#allocation8 + $0x58] sm:$0xff] }
  0xc6   :  { %975 = vmatprep.subr.bf16.mxu0 %v2235_v1  ;;  %1081 = vmatprep.subr.bf16.mxu1 %v2238_v2  ;;  %v1161_v1 = vld [vmem:[#allocation7 + $0x148] sm:$0xff]  ;;  %v1146_v2 = vld [vmem:[#allocation7 + $0xd0] sm:$0xff]  ;;  %v1377_v57 = vld [vmem:[#allocation8 + $0x78] sm:$0xff] }
  0xc9   :  { %976 = vmatpush1.bf16.msra.mxu0 %v2233_v7  ;;  %1082 = vmatpush1.bf16.msra.mxu1 %v2236_v8  ;;  %v1935_v7 = vpack.c.bf16 %v1161_v1, %v1160_v0  ;;  %v1130_v8 = vld [vmem:[#allocation7 + $0x50] sm:$0xff] }
  0xca   :  { %1886 = vmatprep.subr.bf16.mxu0 %v1885_v10  ;;  %1918 = vmatprep.subr.bf16.mxu1 %v1917_v11  ;;  %v1905_v10 = vpack.c.bf16 %v1147_v3, %v1146_v2  ;;  %v1937_v11 = vpack.c.bf16 %v1179_v5, %v1178_v4  ;;  %v1953_v4 = vpack.c.bf16 %v1375_v53, %v1371_v52  ;;  %v1370_v5 = vld [vmem:[#allocation8 + $0x40] sm:$0xff]  ;;  %v1388_v53 = vld [vmem:[#allocation8 + $0xd0] sm:$0xff] }
  0xcc   :  { %978 = vmatmul.mubr.bf16.vlgmr.msra.gmra.mrb[0].mxu0 %v2239_v9  ;;  %1084 = vmatmul.mubr.bf16.vlgmr.msra.gmra.mrb[0].mxu1 %v2239_v9  ;;  %v1131_v9 = vld [vmem:[#allocation7 + $0x58] sm:$0xff] }
  0xcd   :  { %987 = vmatprep.mubr.bf16.mxu0 %v2242_v20  ;;  %1093 = vmatprep.mubr.bf16.mxu1 %v2242_v20  ;;  %v1907_v18 = vpack.c.bf16 %v1131_v9, %v1130_v8  ;;  %v1132_v20 = vld [vmem:[#allocation7 + $0x60] sm:$0xff]  ;;  %v1985_v9 = vpack.c.bf16 %v1377_v57, %v1373_v56  ;;  %v1395_v56 = vld [vmem:[#allocation8 + $0x108] sm:$0xff] }
  0xce   :  { %1888 = vmatpush3.bf16.msra.mxu0 %v1887_v21  ;;  %1920 = vmatpush3.bf16.msra.mxu1 %v1919_v22  ;;  %v1909_v21 = vpack.c.bf16 %v1149_v15, %v1148_v14  ;;  %v1941_v22 = vpack.c.bf16 %v1181_v17, %v1180_v16  ;;  %v1383_v17 = vld [vmem:[#allocation8 + $0xa8] sm:$0xff] }
  0xcf   :  { %1890 = vmatprep.subr.bf16.mxu0 %v1889_v25  ;;  %1922 = vmatprep.subr.bf16.mxu1 %v1921_v26  ;;  %v1165_v25 = vld [vmem:[#allocation7 + $0x168] sm:$0xff]  ;;  %v1911_v26 = vpack.c.bf16 %v1133_v23, %v1132_v20  ;;  %v1382_v23 = vld [vmem:[#allocation8 + $0xa0] sm:$0xff] }
  0xd0   :  { %v1943_v27 = vpack.c.bf16 %v1165_v25, %v1164_v24  ;;  %v1399_v57 = vld [vmem:[#allocation8 + $0x128] sm:$0xff] }
  0xd2   :  { %1892 = vmatpush3.bf16.msra.mxu0 %v1891_v34  ;;  %1924 = vmatpush3.bf16.msra.mxu1 %v1923_v35  ;;  %v1135_v34 = vld [vmem:[#allocation7 + $0x78] sm:$0xff]  ;;  %v1945_v35 = vpack.c.bf16 %v1183_v32, %v1182_v30  ;;  %v1957_v32 = vpack.c.bf16 %v1383_v17, %v1379_v13  ;;  %v1404_v13 = vld [vmem:[#allocation8 + $0x150] sm:$0xff]  ;;  %v1415_v17 = vld [vmem:[#allocation8 + $0x1a8] sm:$0xff] }
  0xd3   :  { %1894 = vmatprep.subr.bf16.mxu0 %v1893_v38  ;;  %1926 = vmatprep.subr.bf16.mxu1 %v1925_v39  ;;  %v1167_v38 = vld [vmem:[#allocation7 + $0x178] sm:$0xff] }
  0xd4   :  { %988 = vmatmul.mubr.bf16.gmra.mrb[4].mxu0 %v2244_v33  ;;  %1094 = vmatmul.mubr.bf16.gmra.mrb[4].mxu1 %v2244_v33  ;;  %v1134_v33 = vld [vmem:[#allocation7 + $0x70] sm:$0xff]  ;;  %v1947_v39 = vpack.c.bf16 %v1167_v38, %v1166_v37 }
  0xd5   :  { %v1915_v36 = vpack.c.bf16 %v1135_v34, %v1134_v33 }
  0xd6   :  { %1896 = vmatpush3.bf16.msra.mxu0 %v1895_v46  ;;  %1928 = vmatpush3.bf16.msra.mxu1 %v1927_v47  ;;  %v1362_v46 = vld [vmem:[#allocation8] sm:$0xff] }
  0xd7   :  { %1898 = vmatprep.subr.bf16.mxu0 %v1897_v50  ;;  %1930 = vmatprep.subr.bf16.mxu1 %v1929_v51  ;;  %v1366_v47 = vld [vmem:[#allocation8 + $0x20] sm:$0xff]  ;;  %v1368_v51 = vld [vmem:[#allocation8 + $0x30] sm:$0xff] }
  0xd8   :  { %v1983_v3 = vpack.c.bf16 %v1368_v51, %v1364_v48  ;;  %v1393_v48 = vld [vmem:[#allocation8 + $0xf8] sm:$0xff] }
  0xda   :  { %1900 = vmatpush3.bf16.msra.mxu0 %v1899_v58  ;;  %1932 = vmatpush3.bf16.msra.mxu1 %v1931_v59 }
  0xdb   :  { %1902 = vmatprep.subr.bf16.mxu0 %v1901_v62  ;;  %1934 = vmatprep.subr.bf16.mxu1 %v1933_v63  ;;  %v1951_v62 = vpack.c.bf16 %v1366_v47, %v1362_v46  ;;  %v1389_v46 = vld [vmem:[#allocation8 + $0xd8] sm:$0xff] }
  0xdc   :  { %v1993_v51 = vpack.c.bf16 %v1393_v48, %v1389_v46 }
  0xde   :  { %1904 = vmatpush3.bf16.msra.mxu0 %v1903_v6  ;;  %1936 = vmatpush3.bf16.msra.mxu1 %v1935_v7  ;;  %v1374_v6 = vld [vmem:[#allocation8 + $0x60] sm:$0xff] }
  0xdf   :  { %1906 = vmatprep.subr.bf16.mxu0 %v1905_v10  ;;  %1938 = vmatprep.subr.bf16.mxu1 %v1937_v11  ;;  %v1372_v10 = vld [vmem:[#allocation8 + $0x50] sm:$0xff]  ;;  %v1955_v12 = vpack.c.bf16 %v1374_v6, %v1370_v5  ;;  %v1407_v5 = vld [vmem:[#allocation8 + $0x168] sm:$0xff]  ;;  %v1405_v6 = vld [vmem:[#allocation8 + $0x158] sm:$0xff] }
  0xe0   :  { %v1376_v11 = vld [vmem:[#allocation8 + $0x70] sm:$0xff] }
  0xe1   :  { %v1987_v16 = vpack.c.bf16 %v1376_v11, %v1372_v10  ;;  %v1406_v10 = vld [vmem:[#allocation8 + $0x160] sm:$0xff] }
  0xe2   :  { %1908 = vmatpush3.bf16.msra.mxu0 %v1907_v18  ;;  %1940 = vmatpush3.bf16.msra.mxu1 %v1939_v19  ;;  %v1381_v18 = vld [vmem:[#allocation8 + $0x98] sm:$0xff] }
  0xe3   :  { %1910 = vmatprep.subr.bf16.mxu0 %v1909_v21  ;;  %1942 = vmatprep.subr.bf16.mxu1 %v1941_v22  ;;  %v1385_v19 = vld [vmem:[#allocation8 + $0xb8] sm:$0xff]  ;;  %v1378_v22 = vld [vmem:[#allocation8 + $0x80] sm:$0xff] }
  0xe4   :  { %v1989_v33 = vpack.c.bf16 %v1385_v19, %v1381_v18  ;;  %v1959_v38 = vpack.c.bf16 %v1382_v23, %v1378_v22  ;;  %v1413_v18 = vld [vmem:[#allocation8 + $0x198] sm:$0xff]  ;;  %v1414_v22 = vld [vmem:[#allocation8 + $0x1a0] sm:$0xff] }
  0xe6   :  { %1912 = vmatpush3.bf16.msra.mxu0 %v1911_v26  ;;  %1944 = vmatpush3.bf16.msra.mxu1 %v1943_v27  ;;  %v1380_v26 = vld [vmem:[#allocation8 + $0x90] sm:$0xff] }
  0xe7   :  { %1914 = vmatprep.subr.bf16.mxu0 %v1913_v31  ;;  %1946 = vmatprep.subr.bf16.mxu1 %v1945_v35  ;;  %v1384_v27 = vld [vmem:[#allocation8 + $0xb0] sm:$0xff] }
  0xe8   :  { %v1991_v41 = vpack.c.bf16 %v1384_v27, %v1380_v26  ;;  %v1416_v26 = vld [vmem:[#allocation8 + $0x1b0] sm:$0xff] }
  0xea   :  { %1916 = vmatpush3.bf16.msra.mxu0 %v1915_v36  ;;  %1948 = vmatpush3.bf16.msra.mxu1 %v1947_v39 }
  0xeb   :  { %1950 = vmatprep.subr.bf16.mxu0 %v1949_v43  ;;  %1982 = vmatprep.subr.bf16.mxu1 %v1981_v45  ;;  %v1391_v45 = vld [vmem:[#allocation8 + $0xe8] sm:$0xff] }
  0xec   :  { %v1961_v47 = vpack.c.bf16 %v1391_v45, %v1387_v44 }
 0x19f   :  { %v979_v49 = vpop.f32.mrb[0].mxu0  ;;  %v1085_v50 = vpop.f32.mrb[0].mxu1 }
 0x1a0   :  { %v981_v54 = vpop.f32.mrb[1].mxu0  ;;  %v1087_v55 = vpop.f32.mrb[1].mxu1  ;;  %v1104_v63 = vmul.f32 %v979_v49, %v979_v49  ;;  %v1106_v0 = vmul.f32 %v1085_v50, %v1085_v50  ;;  %v1386_v49 = vld [vmem:[#allocation8 + $0xc0] sm:$0xff] }
 0x1a1   :  { %v1105_v58 = vmul.f32 %v981_v54, %v981_v54  ;;  %v1107_v59 = vmul.f32 %v1087_v55, %v1087_v55  ;;  %v983_v60 = vpop.f32.mrb[2].mxu0  ;;  %v1089_v61 = vpop.f32.mrb[2].mxu1  ;;  %v1390_v50 = vld [vmem:[#allocation8 + $0xe0] sm:$0xff]  ;;  %v1392_v54 = vld [vmem:[#allocation8 + $0xf0] sm:$0xff] }
 0x1a2   :  { %v985_v1 = vpop.f32.mrb[3].mxu0  ;;  %v1091_v2 = vpop.f32.mrb[3].mxu1  ;;  %v1108_v14 = vmul.f32 %v983_v60, %v983_v60  ;;  %v1110_v15 = vmul.f32 %v1089_v61, %v1089_v61  ;;  %v1963_v52 = vpack.c.bf16 %v1390_v50, %v1386_v49  ;;  %v1995_v55 = vpack.c.bf16 %v1392_v54, %v1388_v53  ;;  %v1401_v60 = vld [vmem:[#allocation8 + $0x138] sm:$0xff]  ;;  %v1394_v61 = vld [vmem:[#allocation8 + $0x100] sm:$0xff] }
 0x1a3   :  { %v1109_v7 = vmul.f32 %v985_v1, %v985_v1  ;;  %v1111_v8 = vmul.f32 %v1091_v2, %v1091_v2  ;;  %1248 = vmatprep.mubr.f32.mxu0 %v1105_v58  ;;  %1333 = vmatprep.mubr.f32.mxu1 %v1107_v59  ;;  %v1397_v58 = vld [vmem:[#allocation8 + $0x118] sm:$0xff]  ;;  %v1965_v59 = vpack.c.bf16 %v1399_v57, %v1395_v56  ;;  %v1396_v1 = vld [vmem:[#allocation8 + $0x110] sm:$0xff] }
 0x1a4   :  { %1249 = vmatmul.mubr.f32.vlgmr.msra.gmra.mrb[8].mxu0 %v1104_v63  ;;  %1334 = vmatmul.mubr.f32.vlgmr.msra.gmra.mrb[8].mxu1 %v1106_v0  ;;  %v1997_v63 = vpack.c.bf16 %v1401_v60, %v1397_v58  ;;  %v1400_v2 = vld [vmem:[#allocation8 + $0x130] sm:$0xff] }
 0x1a5   :  { %1253 = vmatprep.mubr.f32.mxu0 %v1109_v7  ;;  %1338 = vmatprep.mubr.f32.mxu1 %v1111_v8  ;;  %v1409_v8 = vld [vmem:[#allocation8 + $0x178] sm:$0xff] }
 0x1a6   :  { %1952 = vmatpush1.bf16.msra.mxu0 %v1951_v62  ;;  %1984 = vmatpush1.bf16.msra.mxu1 %v1983_v3  ;;  %v1398_v62 = vld [vmem:[#allocation8 + $0x120] sm:$0xff]  ;;  %v1999_v3 = vpack.c.bf16 %v1400_v2, %v1396_v1  ;;  %v2001_v11 = vpack.c.bf16 %v1409_v8, %v1405_v6 }
 0x1a7   :  { %v989_v20 = vpop.f32.mrb[4].mxu0  ;;  %v1095_v21 = vpop.f32.mrb[4].mxu1  ;;  %1954 = vmatprep.subr.bf16.mxu0 %v1953_v4  ;;  %1986 = vmatprep.subr.bf16.mxu1 %v1985_v9  ;;  %v1967_v0 = vpack.c.bf16 %v1398_v62, %v1394_v61  ;;  %v1403_v4 = vld [vmem:[#allocation8 + $0x148] sm:$0xff]  ;;  %v1402_v9 = vld [vmem:[#allocation8 + $0x140] sm:$0xff] }
 0x1a8   :  { %v991_v24 = vpop.f32.mrb[5].mxu0  ;;  %v1097_v25 = vpop.f32.mrb[5].mxu1  ;;  %1254 = vmatmul.mubr.f32.gmra.mrb[10].mxu0 %v1108_v14  ;;  %1339 = vmatmul.mubr.f32.gmra.mrb[10].mxu1 %v1110_v15  ;;  %v1112_v34 = vmul.f32 %v989_v20, %v989_v20  ;;  %v1114_v35 = vmul.f32 %v1095_v21, %v1095_v21  ;;  %v1969_v7 = vpack.c.bf16 %v1407_v5, %v1403_v4  ;;  %v1408_v14 = vld [vmem:[#allocation8 + $0x170] sm:$0xff]  ;;  %v1417_v20 = vld [vmem:[#allocation8 + $0x1b8] sm:$0xff]  ;;  %v1410_v21 = vld [vmem:[#allocation8 + $0x180] sm:$0xff] }
 0x1a9   :  { %v1113_v28 = vmul.f32 %v991_v24, %v991_v24  ;;  %v1115_v29 = vmul.f32 %v1097_v25, %v1097_v25  ;;  %v993_v30 = vpop.f32.mrb[6].mxu0  ;;  %v1099_v31 = vpop.f32.mrb[6].mxu1  ;;  %v2003_v15 = vpack.c.bf16 %v1408_v14, %v1404_v13  ;;  %v2005_v23 = vpack.c.bf16 %v1417_v20, %v1413_v18  ;;  %v1412_v25 = vld [vmem:[#allocation8 + $0x190] sm:$0xff] }
 0x1aa   :  { %v995_v36 = vpop.f32.mrb[7].mxu0  ;;  %v1101_v37 = vpop.f32.mrb[7].mxu1  ;;  %1956 = vmatpush1.bf16.msra.mxu0 %v1955_v12  ;;  %1988 = vmatpush1.bf16.msra.mxu1 %v1987_v16  ;;  %v1116_v42 = vmul.f32 %v993_v30, %v993_v30  ;;  %v1118_v43 = vmul.f32 %v1099_v31, %v1099_v31  ;;  %v1971_v12 = vpack.c.bf16 %v1406_v10, %v1402_v9  ;;  %v1411_v16 = vld [vmem:[#allocation8 + $0x188] sm:$0xff]  ;;  %v1421_v30 = vld [vmem:[#allocation8 + $0x1d8] sm:$0xff] }
 0x1ab   :  { %v1117_v39 = vmul.f32 %v995_v36, %v995_v36  ;;  %v1119_v40 = vmul.f32 %v1101_v37, %v1101_v37  ;;  %1258 = vmatprep.mubr.f32.mxu0 %v1113_v28  ;;  %1343 = vmatprep.mubr.f32.mxu1 %v1115_v29  ;;  %v1973_v19 = vpack.c.bf16 %v1415_v17, %v1411_v16  ;;  %v1419_v28 = vld [vmem:[#allocation8 + $0x1c8] sm:$0xff]  ;;  %v1420_v37 = vld [vmem:[#allocation8 + $0x1d0] sm:$0xff]  ;;  %v1428_v17 = vlaneseq }
 0x1ac   :  { %1259 = vmatmul.mubr.f32.gmra.mrb[12].mxu0 %v1112_v34  ;;  %1344 = vmatmul.mubr.f32.gmra.mrb[12].mxu1 %v1114_v35  ;;  %v1975_v24 = vpack.c.bf16 %v1414_v22, %v1410_v21  ;;  %v2007_v27 = vpack.c.bf16 %v1416_v26, %v1412_v25  ;;  %v1423_v29 = vld [vmem:[#allocation8 + $0x1e8] sm:$0xff]  ;;  %v1422_v34 = vld [vmem:[#allocation8 + $0x1e0] sm:$0xff] }
 0x1ad   :  { %1263 = vmatprep.mubr.f32.mxu0 %v1117_v39  ;;  %1348 = vmatprep.mubr.f32.mxu1 %v1119_v40  ;;  %v1977_v31 = vpack.c.bf16 %v1423_v29, %v1419_v28  ;;  %v2381_v40 = vmov 0.0   ;;  %v1429_v18 = vshrl.u32 %v1428_v17, 7  ;;  %v1426_v21 = vld [vmem:[%s2493_s4] sm:$0xf]  ;;  %s2382_s4 = smov [#allocation10]  }
 0x1ae   :  { %1958 = vmatprep.subr.bf16.mxu0 %v1957_v32  ;;  %1990 = vmatprep.subr.bf16.mxu1 %v1989_v33  ;;  %v1425_v32 = vld [vmem:[#allocation8 + $0x1f8] sm:$0xff]  ;;  %v1418_v33 = vld [vmem:[#allocation8 + $0x1c0] sm:$0xff]  ;;  %s1647_s19 = sshll.u32 %s2382_s4, 4  ;;  %s1648_s19 = int_to_ptr.vmem [resolvable:$true] %s1647_s19 }
 0x1af   :  { %1960 = vmatpush1.bf16.msra.mxu0 %v1959_v38  ;;  %1992 = vmatpush1.bf16.msra.mxu1 %v1991_v41  ;;  %v2009_v35 = vpack.c.bf16 %v1425_v32, %v1421_v30  ;;  %v1979_v36 = vpack.c.bf16 %v1422_v34, %v1418_v33  ;;  %v1424_v38 = vld [vmem:[#allocation8 + $0x1f0] sm:$0xff]  ;;  %v1438_v20 = vsub.s32 2, %v1429_v18  ;;  %v1434_v22 = vsub.s32 1, %v1429_v18  ;;  %s2341_s20 = scalar_lea.vmem %s1648_s19, 2048  ;;  %p2346_p5 = scmp.lt.s32.totalorder %s1648_s19, %s1648_s19 }
 0x1b0   :  { %1264 = vmatmul.mubr.f32.gmra.mrb[14].mxu0 %v1116_v42  ;;  %1349 = vmatmul.mubr.f32.gmra.mrb[14].mxu1 %v1118_v43  ;;  %v2011_v39 = vpack.c.bf16 %v1424_v38, %v1420_v37  ;;  %p2342_p4 = scmp.ne.s32.totalorder %s1648_s19, %s2341_s20  ;;  %p2347_p6 = scmp.lt.s32.totalorder %s2341_s20, %s2341_s20 }
 0x1b1   :  { %1962 = vmatprep.subr.bf16.mxu0 %v1961_v47  ;;  %1994 = vmatprep.subr.bf16.mxu1 %v1993_v51  ;;  %v1439_v25 = vrot.slane %v1426_v21, %v1438_v20  ;;  %v1435_v26 = vrot.slane %v1426_v21, %v1434_v22 }
 0x1b2   :  { %1512 = vmatprep.mubr.f32.mxu0 %v2381_v40  ;;  %1601 = vmatprep.mubr.f32.mxu1 %v2381_v40  ;;  %p2348_p7 = por %p2347_p6, %p2346_p5 }
 0x1b3   :  { %1964 = vmatpush1.bf16.msra.mxu0 %v1963_v52  ;;  %1996 = vmatpush1.bf16.msra.mxu1 %v1995_v55 }
 0x1b4   :  { %1966 = vmatprep.subr.bf16.mxu0 %v1965_v59  ;;  %1998 = vmatprep.subr.bf16.mxu1 %v1997_v63  ;;  %p2349_p8 = pnand %p2348_p7, %p2342_p4 }
 0x1b7   :  { %1968 = vmatpush1.bf16.msra.mxu0 %v1967_v0  ;;  %2000 = vmatpush1.bf16.msra.mxu1 %v1999_v3 }
 0x1b8   :  { %1970 = vmatprep.subr.bf16.mxu0 %v1969_v7  ;;  %2002 = vmatprep.subr.bf16.mxu1 %v2001_v11 }
 0x1bb   :  { %1972 = vmatpush1.bf16.msra.mxu0 %v1971_v12  ;;  %2004 = vmatpush1.bf16.msra.mxu1 %v2003_v15 }
 0x1bc   :  { %1974 = vmatprep.subr.bf16.mxu0 %v1973_v19  ;;  %2006 = vmatprep.subr.bf16.mxu1 %v2005_v23  ;;  %v1430_v19 = vsub.s32 0, %v1429_v18  ;;  %v1442_v23 = vsub.s32 3, %v1429_v18 }
 0x1bf   :  { %1976 = vmatpush1.bf16.msra.mxu0 %v1975_v24  ;;  %2008 = vmatpush1.bf16.msra.mxu1 %v2007_v27  ;;  %v1431_v24 = vrot.slane %v1426_v21, %v1430_v19  ;;  %v1443_v27 = vrot.slane %v1426_v21, %v1442_v23 }
 0x1c0   :  { %1978 = vmatprep.subr.bf16.mxu0 %v1977_v31  ;;  %2010 = vmatprep.subr.bf16.mxu1 %v2009_v35 }
 0x1c3   :  { %1980 = vmatpush1.bf16.msra.mxu0 %v1979_v36  ;;  %2012 = vmatpush1.bf16.msra.mxu1 %v2011_v39 }
 0x277   :  { %v1829_v41 = vpop.f32.mrb[8].mxu0  ;;  %v1873_v42 = vpop.f32.mrb[8].mxu1 }
 0x278   :  { %v1830_v43 = vpop.f32.mrb[9].mxu0  ;;  %v1874_v44 = vpop.f32.mrb[9].mxu1 }
 0x279   :  { %v1831_v45 = vadd.f32 %v1830_v43, %v1829_v41  ;;  %v1875_v46 = vadd.f32 %v1874_v44, %v1873_v42 }
 0x27b   :  { %v1251_v47 = vadd.f32 1e-06, %v1831_v45  ;;  %v1832_v48 = vpop.f32.mrb[10].mxu0  ;;  %v1876_v49 = vpop.f32.mrb[10].mxu1 }
 0x27c   :  { %v1833_v50 = vpop.f32.mrb[11].mxu0  ;;  %v1877_v51 = vpop.f32.mrb[11].mxu1 }
 0x27d   :  { %v1336_v52 = vadd.f32 %v1875_v46, %v1251_v47  ;;  %v1834_v53 = vadd.f32 %v1833_v50, %v1832_v48  ;;  %v1878_v54 = vadd.f32 %v1877_v51, %v1876_v49 }
 0x27f   :  { %2245 = vlog2.f32 %v1336_v52  ;;  %v1256_v55 = vadd.f32 1e-06, %v1834_v53  ;;  %v1835_v56 = vpop.f32.mrb[12].mxu0  ;;  %v1879_v57 = vpop.f32.mrb[12].mxu1 }
 0x280   :  { %v1836_v58 = vpop.f32.mrb[13].mxu0  ;;  %v1880_v59 = vpop.f32.mrb[13].mxu1 }
 0x281   :  { %v1341_v60 = vadd.f32 %v1878_v54, %v1256_v55  ;;  %v1837_v61 = vadd.f32 %v1836_v58, %v1835_v56  ;;  %v1881_v62 = vadd.f32 %v1880_v59, %v1879_v57 }
 0x283   :  { %2247 = vlog2.f32 %v1341_v60  ;;  %v1261_v63 = vadd.f32 1e-06, %v1837_v61  ;;  %v1838_v0 = vpop.f32.mrb[14].mxu0  ;;  %v1882_v1 = vpop.f32.mrb[14].mxu1 }
 0x284   :  { %v1839_v2 = vpop.f32.mrb[15].mxu0  ;;  %v1883_v3 = vpop.f32.mrb[15].mxu1 }
 0x285   :  { %v1346_v4 = vadd.f32 %v1881_v62, %v1261_v63  ;;  %v1840_v5 = vadd.f32 %v1839_v2, %v1838_v0  ;;  %v1884_v6 = vadd.f32 %v1883_v3, %v1882_v1 }
 0x287   :  { %2249 = vlog2.f32 %v1346_v4  ;;  %v1266_v7 = vadd.f32 1e-06, %v1840_v5 }
 0x289   :  { %v2246_v8 = vpop.eup %2245  ;;  %v1351_v9 = vadd.f32 %v1884_v6, %v1266_v7 }
 0x28a   :  { %v1355_v10 = vmul.f32 0.6931472, %v2246_v8 }
 0x28b   :  { %2251 = vlog2.f32 %v1351_v9 }
 0x28c   :  { %1513 = vmatmul.mubr.f32.vlgmr.msra.gmra.mrb[16].mxu0 %v1355_v10  ;;  %1602 = vmatmul.mubr.f32.vlgmr.msra.gmra.mrb[16].mxu1 %v1355_v10 }
 0x28d   :  { %v2248_v11 = vpop.eup %2247  ;;  %1518 = vmatprep.mubr.f32.mxu0 %v2381_v40  ;;  %1607 = vmatprep.mubr.f32.mxu1 %v2381_v40 }
 0x28e   :  { %v1357_v12 = vmul.f32 0.6931472, %v2248_v11 }
 0x290   :  { %1519 = vmatmul.mubr.f32.gmra.mrb[18].mxu0 %v1357_v12  ;;  %1608 = vmatmul.mubr.f32.gmra.mrb[18].mxu1 %v1357_v12 }
 0x291   :  { %v2250_v13 = vpop.eup %2249  ;;  %1524 = vmatprep.mubr.f32.mxu0 %v2381_v40  ;;  %1613 = vmatprep.mubr.f32.mxu1 %v2381_v40 }
 0x292   :  { %v1359_v14 = vmul.f32 0.6931472, %v2250_v13 }
 0x294   :  { %1525 = vmatmul.mubr.f32.gmra.mrb[20].mxu0 %v1359_v14  ;;  %1614 = vmatmul.mubr.f32.gmra.mrb[20].mxu1 %v1359_v14 }
 0x295   :  { %v2252_v15 = vpop.eup %2251  ;;  %1530 = vmatprep.mubr.f32.mxu0 %v2381_v40  ;;  %1619 = vmatprep.mubr.f32.mxu1 %v2381_v40 }
 0x296   :  { %v1361_v16 = vmul.f32 0.6931472, %v2252_v15 }
 0x298   :  { %1531 = vmatmul.mubr.f32.gmra.mrb[22].mxu0 %v1361_v16  ;;  %1620 = vmatmul.mubr.f32.gmra.mrb[22].mxu1 %v1361_v16 }
 0x35f   :  { %v1514_v28 = vpop.f32.mrb[16].mxu0  ;;  %v1603_v29 = vpop.f32.mrb[16].mxu1 }
 0x360   :  { %v1515_v30 = vadd.f32 %v1514_v28, %v1431_v24  ;;  %v1604_v31 = vadd.f32 %v1603_v29, %v1439_v25  ;;  %v1516_v32 = vpop.f32.mrb[17].mxu0  ;;  %v1605_v33 = vpop.f32.mrb[17].mxu1 }
 0x361   :  { %v1517_v34 = vadd.f32 %v1516_v32, %v1435_v26  ;;  %v1606_v35 = vadd.f32 %v1605_v33, %v1443_v27 }
 0x362   :  { %1626 = vst [vmem:[#allocation10] sm:$0xff] %v1515_v30  ;;  %1628 = vst [vmem:[#allocation10 + $0x10] sm:$0xff] %v1604_v31 }
 0x363   :  { %1627 = vst [vmem:[#allocation10 + $0x8] sm:$0xff] %v1517_v34  ;;  %1629 = vst [vmem:[#allocation10 + $0x18] sm:$0xff] %v1606_v35  ;;  %v1520_v36 = vpop.f32.mrb[18].mxu0  ;;  %v1609_v37 = vpop.f32.mrb[18].mxu1 }
 0x364   :  { %v1521_v38 = vadd.f32 %v1520_v36, %v1431_v24  ;;  %v1610_v39 = vadd.f32 %v1609_v37, %v1439_v25  ;;  %v1522_v40 = vpop.f32.mrb[19].mxu0  ;;  %v1611_v41 = vpop.f32.mrb[19].mxu1 }
 0x365   :  { %v1523_v42 = vadd.f32 %v1522_v40, %v1435_v26  ;;  %v1612_v43 = vadd.f32 %v1611_v41, %v1443_v27 }
 0x366   :  { %1630 = vst [vmem:[#allocation10 + $0x20] sm:$0xff] %v1521_v38  ;;  %1632 = vst [vmem:[#allocation10 + $0x30] sm:$0xff] %v1610_v39 }
 0x367   :  { %1631 = vst [vmem:[#allocation10 + $0x28] sm:$0xff] %v1523_v42  ;;  %1633 = vst [vmem:[#allocation10 + $0x38] sm:$0xff] %v1612_v43  ;;  %v1526_v44 = vpop.f32.mrb[20].mxu0  ;;  %v1615_v45 = vpop.f32.mrb[20].mxu1 }
 0x368   :  { %v1527_v46 = vadd.f32 %v1526_v44, %v1431_v24  ;;  %v1616_v47 = vadd.f32 %v1615_v45, %v1439_v25  ;;  %v1528_v48 = vpop.f32.mrb[21].mxu0  ;;  %v1617_v49 = vpop.f32.mrb[21].mxu1 }
 0x369   :  { %v1529_v50 = vadd.f32 %v1528_v48, %v1435_v26  ;;  %v1618_v51 = vadd.f32 %v1617_v49, %v1443_v27 }
 0x36a   :  { %1634 = vst [vmem:[#allocation10 + $0x40] sm:$0xff] %v1527_v46  ;;  %1636 = vst [vmem:[#allocation10 + $0x50] sm:$0xff] %v1616_v47 }
 0x36b   :  { %1635 = vst [vmem:[#allocation10 + $0x48] sm:$0xff] %v1529_v50  ;;  %1637 = vst [vmem:[#allocation10 + $0x58] sm:$0xff] %v1618_v51  ;;  %v1532_v52 = vpop.f32.mrb[22].mxu0  ;;  %v1621_v53 = vpop.f32.mrb[22].mxu1 }
 0x36c   :  { %v1533_v54 = vadd.f32 %v1532_v52, %v1431_v24  ;;  %v1622_v55 = vadd.f32 %v1621_v53, %v1439_v25  ;;  %v1534_v56 = vpop.f32.mrb[23].mxu0  ;;  %v1623_v57 = vpop.f32.mrb[23].mxu1 }
 0x36d   :  { %v1535_v58 = vadd.f32 %v1534_v56, %v1435_v26  ;;  %v1624_v59 = vadd.f32 %v1623_v57, %v1443_v27 }
 0x36e   :  { %1638 = vst [vmem:[#allocation10 + $0x60] sm:$0xff] %v1533_v54  ;;  %1640 = vst [vmem:[#allocation10 + $0x70] sm:$0xff] %v1622_v55 }
 0x36f   :  { %1639 = vst [vmem:[#allocation10 + $0x68] sm:$0xff] %v1535_v58  ;;  %1641 = vst [vmem:[#allocation10 + $0x78] sm:$0xff] %v1624_v59 }
 0x370   :  { %2352 = shalt.err (!%p2349_p8)
}
 0x371   :  { %s2353_s24 = scalar_lea.hbm %s2494_s5, 2048 }
 0x372   :  { %p2354_p9 = scmp.ne.s32.totalorder %s2494_s5, %s2353_s24  ;;  %p2357_p10 = scmp.lt.u32.totalorder %s2353_s24, %s2494_s5 }
 0x374   :  { %p2359_p11 = pnand %p2357_p10, %p2354_p9 }
 0x376   :  { %2362 = shalt.err (!%p2359_p11)
}
 0x377   :  { %1653 = dma.vmem_to_hbm [thread:$0]  %s1648_s19, 2048, %s2494_s5, [#allocation4], %s2379_s2, %s2379_s2, %s2380_s16  }
 0x378   :  { %2369 = dma.done.wait [#allocation4], 2048  }
 0x379   :  { %2370 = vsyncadd [#allocation4], 4294965248 }
 0x37a   :  { %1657 = vsyncpa [#allocation3], 1 }
 0x37b   :  { %1658 = vsyncpa [#allocation6], 1 }
 0x37c   :  { %1659 = vsyncpa [#allocation9], 1 }
 0x37d   :  { %1660 = vsyncpa [#allocation4], 1 }

</bundles_post_ra>
